<compile_context>
chip_gen: v5e
topology: v5e:2x2
jax: 0.10.0
libtpu: 0.0.40
codegen_flags: <defaults>
</compile_context>

<pallas_src>
import numpy as np
import jax
import jax.numpy as jnp
from jax.experimental import pallas as pl
from jax.experimental.pallas import tpu as pltpu

MATMUL_DTYPE = jnp.bfloat16   # conv / upsample operand dtype (accumulation is always f32)
OUT_DTYPE = jnp.bfloat16      # kernel output dtype (halves the dominant HBM write)


# ----------------------------------------------------------------------------
# Exact separable matrices for AdaptiveAvgPool2d and bilinear(align_corners=True)
# ----------------------------------------------------------------------------
def _pool_matrix_1d(in_size: int, out_size: int) -> np.ndarray:
    """Row i averages input indices [floor(i*in/out), ceil((i+1)*in/out))."""
    m = np.zeros((out_size, in_size), np.float32)
    for i in range(out_size):
        s = (i * in_size) // out_size
        e = -((-(i + 1) * in_size) // out_size)  # ceil division
        m[i, s:e] = 1.0 / float(e - s)
    return m


def _upsample_matrix_1d(out_size: int, in_size: int) -> np.ndarray:
    """Linear-interp matrix for F.interpolate(..., mode='bilinear', align_corners=True)."""
    m = np.zeros((out_size, in_size), np.float32)
    if in_size == 1:
        m[:, 0] = 1.0
        return m
    if out_size == 1:
        m[0, 0] = 1.0
        return m
    for i in range(out_size):
        src = i * (in_size - 1) / (out_size - 1)
        f = int(np.floor(src))
        if f >= in_size - 1:
            f, frac = in_size - 1, 0.0
        else:
            frac = src - f
        m[i, f] += 1.0 - frac
        if frac > 0.0:
            m[i, f + 1] += frac
    return m


# ----------------------------------------------------------------------------
# Fused Pallas kernel
#   grid = (batch, output-channel tile jr, input-channel tile k)   [k innermost]
#   jr == 0 sweep:      pool each x channel slab for ALL bins into a persistent scratch
#   k  == last step(s): per output tile jr: 1x1 conv + bias/ReLU mask + upsample + store
# ----------------------------------------------------------------------------
def _ppm_kernel(x_ref, pT_ref, w_ref, bm_ref, uT_ref, o_ref, pooled_ref):
    jr = pl.program_id(1)            # output-channel (nb*R) tile
    k = pl.program_id(2)             # input-channel reduction tile (innermost)
    c_tile = x_ref.shape[0]

    # Stage 1 (only during the jr == 0 sweep): adaptive-avg-pool this channel slab for all
    # bins at once.  x is cast in-kernel (no separate host-side astype pass over HBM).
    @pl.when(jr == 0)
    def _pool():
        r0 = pl.multiple_of(k * c_tile, c_tile)
        pooled_ref[pl.ds(r0, c_tile), :] = jnp.dot(
            x_ref[...].astype(pT_ref.dtype), pT_ref[...],
            preferred_element_type=jnp.float32)

    # Stages 2+3 (after the last channel slab has been pooled): for this output tile do the
    # 1x1 conv (BN scale folded, streamed weight tile) + BN bias / ReLU block-mask +
    # bilinear upsample, then one full-width lane-dense store in the output dtype.
    @pl.when(k == pl.num_programs(2) - 1)
    def _finalize():
        acc = jnp.dot(w_ref[...], pooled_ref[...].astype(w_ref.dtype),
                      preferred_element_type=jnp.float32)          # (r_tile, BBpad) f32
        y = jnp.maximum(acc + bm_ref[...], 0.0)                    # bias + ReLU + mask
        out = jnp.dot(y.astype(uT_ref.dtype), uT_ref[...],
                      preferred_element_type=jnp.float32)          # (r_tile, HW) f32
        o_ref[...] = out.astype(o_ref.dtype)


# ----------------------------------------------------------------------------
# Tile / VMEM sizing helpers (per-generation via get_tpu_info; never exceed chip VMEM)
# ----------------------------------------------------------------------------
def _round_up(v: int, m: int) -> int:
    return ((v + m - 1) // m) * m


def _vmem_capacity_bytes() -> int:
    try:
        return int(pltpu.get_tpu_info().vmem_capacity_bytes)
    except Exception:
        return 64 << 20   # conservative fallback = v7x per-core VMEM


def _largest_channel_tile(c: int, max_rows: int) -> int:
    """Largest multiple-of-8 divisor of c with a (tile, HW) slab under the budget."""
    best = None
    for d in range(8, c + 1, 8):
        if c % d == 0 and d <= max_rows:
            best = d
    if best is not None:
        return best
    if c <= max_rows:
        return c               # full-dim block is always legal
    for d in range(8, c + 1, 8):
        if c % d == 0:
            return d           # smallest legal tile; vmem_limit below reflects the choice
    return c


def _choose_r_tile(nbr: int, c: int, hw: int, bbpad: int, budget: int,
                   w_item: int, out_item: int) -> int:
    step = 16 if min(w_item, out_item) < 4 else 8   # bf16 native sublane tiling is (16,128)
    per_row = 2 * (c * w_item + bbpad * 4 + hw * out_item) + hw * 4 + 3 * bbpad * 4
    cap = max(step, (budget // max(per_row, 1)) // step * step)
    nbr_p = _round_up(max(nbr, step), step)
    cap = min(cap, nbr_p)
    for d in range(cap, step - 1, -step):           # prefer a tile dividing nbr (no padding)
        if nbr_p % d == 0:
            return d
    return cap


# ----------------------------------------------------------------------------
# Wrappers
# ----------------------------------------------------------------------------
def ppm_branches_pallas(x, fused, *, out_dtype=OUT_DTYPE, c_tile=None, r_tile=None):
    """All pyramid branches fused in one pallas_call. Returns (N, nb*R, H, W) in out_dtype.

    The torch-style channel concat with x is NOT done here: copying x through HBM again
    costs about as much as the whole kernel.  Production consumers should read x and the
    returned branch tensor separately; ppm_pallas() below is a drop-in concatenating shim.
    """
    n, c, h, w = x.shape
    hw = h * w
    pT, wf, bm, uT = fused["PT"], fused["W"], fused["BIASMASK"], fused["UT"]
    nbr = int(fused["NBR"])
    bbpad = pT.shape[1]
    assert wf.shape == (nbr, c) and bm.shape == (nbr, bbpad) and uT.shape == (bbpad, hw)

    x_item = jnp.dtype(x.dtype).itemsize
    w_item = jnp.dtype(wf.dtype).itemsize
    ut_item = jnp.dtype(uT.dtype).itemsize
    pt_item = jnp.dtype(pT.dtype).itemsize
    out_item = jnp.dtype(out_dtype).itemsize

    # Per-generation VMEM budget (never ask Mosaic for more than the chip has).
    vmem_cap = _vmem_capacity_bytes()
    budget = max(vmem_cap - (8 << 20), 16 << 20)     # headroom for Mosaic internals
    resident = 2 * (hw * bbpad * pt_item + bbpad * hw * ut_item) + c * bbpad * 4
    avail = max(budget - resident, 4 << 20)

    if c_tile is None:
        c_tile = _largest_channel_tile(c, max(8, (avail * 2 // 5) // (2 * hw * x_item)))
    if r_tile is None:
        r_tile = _choose_r_tile(nbr, c, hw, bbpad, avail * 2 // 5, w_item, out_item)
    assert c % c_tile == 0 and (c_tile % 8 == 0 or c_tile == c), (c, c_tile)
    assert r_tile % 8 == 0, r_tile

    num_k = c // c_tile
    nbr_tot = _round_up(max(nbr, r_tile), r_tile)
    num_jr = nbr_tot // r_tile

    if nbr_tot > nbr:   # pad: zero conv rows, -1e30 bias-mask rows (ReLU -> 0, sliced off)
        wf = jnp.pad(wf, ((0, nbr_tot - nbr), (0, 0)))
        bm = jnp.pad(bm, ((0, nbr_tot - nbr), (0, 0)), constant_values=-1e30)

    # Metadata-only reshape; NO dtype cast here (the cast happens inside the kernel).
    x_flat = x.reshape(n, c, hw)

    vmem_needed = (2 * c_tile * hw * x_item          # x slabs (double-buffered)
                   + 2 * r_tile * c * w_item         # conv-weight tiles
                   + 2 * r_tile * bbpad * 4          # bias/ReLU mask tiles
                   + 2 * r_tile * hw * out_item      # output tiles
                   + resident                        # PT + UT + pooled scratch
                   + r_tile * hw * 4                 # f32 upsample result before cast
                   + 3 * r_tile * bbpad * 4)         # acc / y temporaries
    vmem_limit = int(min(budget, max(16 << 20, int(vmem_needed * 1.25))))

    flops = int(2 * n * (c * hw * bbpad + nbr_tot * c * bbpad + nbr_tot * bbpad * hw))
    bytes_accessed = int(n * c * hw * x_item                       # x read once
                         + n * nbr_tot * hw * out_item             # output write
                         + n * (wf.size * w_item + bm.size * 4)    # streamed per batch
                         + pT.size * pt_item + uT.size * ut_item)  # residents

    out = pl.pallas_call(
        _ppm_kernel,
        out_shape=jax.ShapeDtypeStruct((n, nbr_tot, hw), out_dtype),
        grid_spec=pltpu.PrefetchScalarGridSpec(
            num_scalar_prefetch=0,
            grid=(n, num_jr, num_k),
            in_specs=[
                # x slab: only fetched during the jr==0 sweep (index frozen afterwards),
                # so x streams from HBM exactly once per image.
                pl.BlockSpec((pl.Squeezed(), c_tile, hw),
                             lambda i, jr, k: (i, jnp.where(jr == 0, k, num_k - 1), 0)),
                pl.BlockSpec((hw, bbpad), lambda i, jr, k: (0, 0)),       # PT (resident, f32)
                pl.BlockSpec((r_tile, c), lambda i, jr, k: (jr, 0)),      # Wf tile (streamed)
                pl.BlockSpec((r_tile, bbpad), lambda i, jr, k: (jr, 0)),  # bias/ReLU mask tile
                pl.BlockSpec((bbpad, hw), lambda i, jr, k: (0, 0)),       # UT (resident)
            ],
            out_specs=pl.BlockSpec((pl.Squeezed(), r_tile, hw),
                                   lambda i, jr, k: (i, jr, 0)),
            scratch_shapes=[pltpu.VMEM((c, bbpad), jnp.float32)],         # pooled activations
        ),
        compiler_params=pltpu.CompilerParams(
            # jr must stay "arbitrary": all output tiles consume the pooled scratch
            # produced on the jr==0 sweep.
            dimension_semantics=("parallel", "arbitrary", "arbitrary"),
            vmem_limit_bytes=vmem_limit),
        cost_estimate=pl.CostEstimate(flops=flops, transcendentals=0,
                                      bytes_accessed=bytes_accessed),
    )(x_flat, pT, wf, bm, uT)

    if nbr_tot > nbr:
        out = out[:, :nbr, :]
    return out.reshape(n, nbr, h, w)


def ppm_pallas(x, fused, **kwargs):
    """Drop-in equivalent of the torch module's forward (channel concat with x).

    NOTE: the concat itself re-streams x through HBM; prefer ppm_branches_pallas and let
    the consumer read (x, branches) separately, or write into a pre-allocated buffer.
    """
    branches = ppm_branches_pallas(x, fused, **kwargs)
    return jnp.concatenate([x, branches.astype(x.dtype)], axis=1)


# ----------------------------------------------------------------------------
# Parameter construction (deterministic, synthetic) + host-side constant fusion
# ----------------------------------------------------------------------------
def make_ppm_params(key, in_dim, reduction_dim, bins, eps=1e-5):
    """Per-branch Conv2d(1x1) weight and eval-mode BatchNorm affine (scale/bias folded)."""
    params = []
    for b in bins:
        key, kw, kg, kb, km, kv = jax.random.split(key, 6)
        conv_w = jax.random.normal(kw, (reduction_dim, in_dim), jnp.float32) * 0.1
        gamma = jax.random.uniform(kg, (reduction_dim,), jnp.float32, 0.5, 1.5)
        beta = jax.random.normal(kb, (reduction_dim,), jnp.float32) * 0.1
        run_mean = jax.random.normal(km, (reduction_dim,), jnp.float32) * 0.1
        run_var = jax.random.uniform(kv, (reduction_dim,), jnp.float32, 0.5, 1.5)
        scale = gamma / jnp.sqrt(run_var + eps)
        bias = beta - run_mean * scale
        params.append(dict(bin=b, W=conv_w, scale=scale, bias=bias))
    return params


def build_fused_constants(params, H, W, lane=128):
    """Concatenate all bins into pre-transposed matrices, fold BN, pad BB to 128 lanes."""
    R = params[0]["W"].shape[0]
    nb = len(params)
    pool_T, up_T, w_rows, bbs = [], [], [], []
    for p in params:
        b = p["bin"]
        pm = np.kron(_pool_matrix_1d(H, b), _pool_matrix_1d(W, b))           # (bb, HW)
        um = np.kron(_upsample_matrix_1d(H, b), _upsample_matrix_1d(W, b))   # (HW, bb)
        pool_T.append(pm.T)                                                  # (HW, bb)
        up_T.append(um.T)                                                    # (bb, HW)
        w_rows.append(np.asarray(p["scale"])[:, None] * np.asarray(p["W"]))  # fold BN scale
        bbs.append(b * b)

    PT = np.concatenate(pool_T, axis=1)      # (HW, BB)
    UT = np.concatenate(up_T, axis=0)        # (BB, HW)
    Wf = np.concatenate(w_rows, axis=0)      # (nbr, C)
    BB = PT.shape[1]
    nbr = nb * R
    BBpad = _round_up(BB, lane)              # lane-dense intermediates (review)

    PTp = np.zeros((PT.shape[0], BBpad), np.float32)
    PTp[:, :BB] = PT
    UTp = np.zeros((BBpad, UT.shape[1]), np.float32)
    UTp[:BB, :] = UT

    # Bias + block mask: on-block = folded BN bias, everywhere else (cross-bin terms and
    # BB padding) = -1e30 so the ReLU zeroes them; no explicit mask or per-bin loop needed.
    bm = np.full((nbr, BBpad), -1e30, np.float32)
    off = 0
    for i, p in enumerate(params):
        bm[i * R:(i + 1) * R, off:off + bbs[i]] = np.asarray(p["bias"])[:, None]
        off += bbs[i]

    return dict(
        PT=jnp.asarray(PTp, jnp.float32),    # f32: keeps 1/3, 1/36-style pool weights exact
        W=jnp.asarray(Wf, MATMUL_DTYPE),
        BIASMASK=jnp.asarray(bm, jnp.float32),
        UT=jnp.asarray(UTp, MATMUL_DTYPE),
        NBR=nbr,
    )


# ----------------------------------------------------------------------------
# Pure-JAX f32 reference (mirrors the torch module, eval-mode BN)
# ----------------------------------------------------------------------------
def ppm_reference(x, params):
    n, c, h, w = x.shape
    hw = h * w
    xf = x.reshape(n, c, hw)
    outs = [x]
    for p in params:
        b = p["bin"]
        R = p["W"].shape[0]
        pm = jnp.asarray(np.kron(_pool_matrix_1d(h, b), _pool_matrix_1d(w, b)))
        um = jnp.asarray(np.kron(_upsample_matrix_1d(h, b), _upsample_matrix_1d(w, b)))
        pooled = jnp.einsum("nch,bh->ncb", xf, pm)
        y = jnp.einsum("rc,ncb->nrb", p["W"], pooled)
        y = jnp.maximum(y * p["scale"][None, :, None] + p["bias"][None, :, None], 0.0)
        o = jnp.einsum("nrb,hb->nrh", y, um)
        outs.append(o.reshape(n, R, h, w))
    return jnp.concatenate(outs, axis=1)


if __name__ == "__main__":
    key = jax.random.PRNGKey(0)
    N, C, H, W = 2, 16, 16, 16
    reduction_dim = 8
    bins = (1, 2, 3, 6)

    kx, kp = jax.random.split(key)
    x = jax.random.normal(kx, (N, C, H, W), jnp.float32)
    params = make_ppm_params(kp, C, reduction_dim, bins)
    fused = build_fused_constants(params, H, W)

    # c_tile=8 -> 2 channel-reduction steps; r_tile=16 -> 2 output tiles per image.
    # This exercises the pooled-scratch accumulation, the frozen-x index map and the
    # per-output-tile finalize/store path.
    out = ppm_pallas(x, fused, c_tile=8, r_tile=16)
    out = jax.block_until_ready(out)

    expected_channels = C + len(bins) * reduction_dim
    assert out.shape == (N, expected_channels, H, W), out.shape
    assert bool(jnp.all(jnp.isfinite(out)))

    ref = ppm_reference(x, params)
    err = float(jnp.max(jnp.abs(out - ref)))
    assert err < 5e-2, f"max abs err vs f32 reference too large: {err}"

    print("KERNEL_OK")
</pallas_src>

<mosaic_0001>
module attributes {stable_mosaic.version = 11 : i64} {
  func.func @_ppm_kernel(%arg0: i32, %arg1: i32, %arg2: i32, %arg3: memref<1x8x256xf32, #tpu.memory_space<vmem>>, %arg4: memref<256x128xf32, #tpu.memory_space<vmem>>, %arg5: memref<16x16xbf16, #tpu.memory_space<vmem>>, %arg6: memref<16x128xf32, #tpu.memory_space<vmem>>, %arg7: memref<128x256xbf16, #tpu.memory_space<vmem>>, %arg8: memref<1x16x256xbf16, #tpu.memory_space<vmem>>, %arg9: memref<16x128xf32, #tpu.memory_space<vmem>>) attributes {dimension_semantics = [#tpu.dimension_semantics<parallel>, #tpu.dimension_semantics<arbitrary>, #tpu.dimension_semantics<arbitrary>], iteration_bounds = array<i64: 2, 2, 2>, scalar_prefetch = 0 : i64, scratch_operands = 1 : i64, tpu.core_type = #tpu.core_type<tc>, window_params = [{transform_indices = @transform_0, window_bounds = array<i64: 1, 8, 256>}, {pipeline_mode = #tpu.pipeline_mode<synchronous>, transform_indices = @transform_1, window_bounds = array<i64: 256, 128>}, {transform_indices = @transform_2, window_bounds = array<i64: 16, 16>}, {transform_indices = @transform_3, window_bounds = array<i64: 16, 128>}, {pipeline_mode = #tpu.pipeline_mode<synchronous>, transform_indices = @transform_4, window_bounds = array<i64: 128, 256>}, {transform_indices = @transform_5, window_bounds = array<i64: 1, 16, 256>}]} {
    %c0_i32 = arith.constant 0 : i32
    %0 = arith.cmpi eq, %arg1, %c0_i32 : i32
    %1 = arith.extui %0 : i1 to i32
    %c0_i32_0 = arith.constant 0 : i32
    %2 = arith.cmpi ne, %1, %c0_i32_0 : i32
    scf.if %2 {
      %c8_i32 = arith.constant 8 : i32
      %6 = arith.muli %arg2, %c8_i32 : i32
      %7 = tpu.assume_multiple %6, 8 : i32
      %c0 = arith.constant 0 : index
      %c0_2 = arith.constant 0 : index
      %c0_3 = arith.constant 0 : index
      %8 = vector.load %arg3[%c0, %c0_2, %c0_3] : memref<1x8x256xf32, #tpu.memory_space<vmem>>, vector<1x8x256xf32>
      %9 = vector.shape_cast %8 : vector<1x8x256xf32> to vector<8x256xf32>
      %c0_4 = arith.constant 0 : index
      %c0_5 = arith.constant 0 : index
      %10 = vector.load %arg4[%c0_4, %c0_5] : memref<256x128xf32, #tpu.memory_space<vmem>>, vector<256x128xf32>
      %cst = arith.constant dense<0.000000e+00> : vector<8x128xf32>
      %11 = tpu.matmul %9, %10, %cst {dimension_numbers = #tpu.dot_dimension_numbers<[1], [0], [0], [1], [0, 0, 1, 1], [], []>} : vector<8x256xf32>, vector<256x128xf32>, vector<8x128xf32> -> vector<8x128xf32>
      %12 = arith.index_cast %7 : i32 to index
      %c0_6 = arith.constant 0 : index
      %13 = vector.load %arg9[%12, %c0_6] : memref<16x128xf32, #tpu.memory_space<vmem>>, vector<8x128xf32>
      tpu.vector_store %arg9[%12, %c0_6], %11 {strides = array<i32>} : memref<16x128xf32, #tpu.memory_space<vmem>>, vector<8x128xf32>,
    } else {
    }
    %c1_i32 = arith.constant 1 : i32
    %3 = arith.cmpi eq, %arg2, %c1_i32 : i32
    %4 = arith.extui %3 : i1 to i32
    %c0_i32_1 = arith.constant 0 : i32
    %5 = arith.cmpi ne, %4, %c0_i32_1 : i32
    scf.if %5 {
      %c0 = arith.constant 0 : index
      %c0_2 = arith.constant 0 : index
      %6 = vector.load %arg5[%c0, %c0_2] : memref<16x16xbf16, #tpu.memory_space<vmem>>, vector<16x16xbf16>
      %c0_3 = arith.constant 0 : index
      %c0_4 = arith.constant 0 : index
      %7 = vector.load %arg9[%c0_3, %c0_4] : memref<16x128xf32, #tpu.memory_space<vmem>>, vector<16x128xf32>
      %8 = arith.truncf %7 : vector<16x128xf32> to vector<16x128xbf16>
      %cst = arith.constant dense<0.000000e+00> : vector<16x128xf32>
      %9 = tpu.matmul %6, %8, %cst {dimension_numbers = #tpu.dot_dimension_numbers<[1], [0], [0], [1], [0, 0, 1, 1], [], []>} : vector<16x16xbf16>, vector<16x128xbf16>, vector<16x128xf32> -> vector<16x128xf32>
      %c0_5 = arith.constant 0 : index
      %c0_6 = arith.constant 0 : index
      %10 = vector.load %arg6[%c0_5, %c0_6] : memref<16x128xf32, #tpu.memory_space<vmem>>, vector<16x128xf32>
      %11 = arith.addf %9, %10 : vector<16x128xf32>
      %cst_7 = arith.constant 0.000000e+00 : f32
      %12 = vector.broadcast %cst_7 : f32 to vector<16x128xf32>
      %13 = arith.maximumf %11, %12 : vector<16x128xf32>
      %14 = arith.truncf %13 : vector<16x128xf32> to vector<16x128xbf16>
      %c0_8 = arith.constant 0 : index
      %c0_9 = arith.constant 0 : index
      %15 = vector.load %arg7[%c0_8, %c0_9] : memref<128x256xbf16, #tpu.memory_space<vmem>>, vector<128x256xbf16>
      %cst_10 = arith.constant dense<0.000000e+00> : vector<16x256xf32>
      %16 = tpu.matmul %14, %15, %cst_10 {dimension_numbers = #tpu.dot_dimension_numbers<[1], [0], [0], [1], [0, 0, 1, 1], [], []>} : vector<16x128xbf16>, vector<128x256xbf16>, vector<16x256xf32> -> vector<16x256xf32>
      %17 = arith.truncf %16 : vector<16x256xf32> to vector<16x256xbf16>
      %c0_11 = arith.constant 0 : index
      %c0_12 = arith.constant 0 : index
      %c0_13 = arith.constant 0 : index
      %18 = vector.load %arg8[%c0_11, %c0_12, %c0_13] : memref<1x16x256xbf16, #tpu.memory_space<vmem>>, vector<1x16x256xbf16>
      %19 = vector.shape_cast %18 : vector<1x16x256xbf16> to vector<16x256xbf16>
      %20 = vector.shape_cast %17 : vector<16x256xbf16> to vector<1x16x256xbf16>
      tpu.vector_store %arg8[%c0_11, %c0_12, %c0_13], %20 {strides = array<i32>} : memref<1x16x256xbf16, #tpu.memory_space<vmem>>, vector<1x16x256xbf16>,
    } else {
    }
    return
  }
  func.func @transform_0(%arg0: i32, %arg1: i32, %arg2: i32) -> (i32, i32, i32) {
    %c0_i32 = arith.constant 0 : i32
    %0 = arith.cmpi eq, %arg1, %c0_i32 : i32
    %c1_i32 = arith.constant 1 : i32
    %1 = arith.select %0, %arg2, %c1_i32 : i32
    %c0_i32_0 = arith.constant 0 : i32
    %c0_i32_1 = arith.constant 0 : i32
    return %arg0, %1, %c0_i32_0 : i32, i32, i32
  }
  func.func @transform_1(%arg0: i32, %arg1: i32, %arg2: i32) -> (i32, i32) {
    %c0_i32 = arith.constant 0 : i32
    %c0_i32_0 = arith.constant 0 : i32
    %c0_i32_1 = arith.constant 0 : i32
    return %c0_i32, %c0_i32_0 : i32, i32
  }
  func.func @transform_2(%arg0: i32, %arg1: i32, %arg2: i32) -> (i32, i32) {
    %c0_i32 = arith.constant 0 : i32
    %c0_i32_0 = arith.constant 0 : i32
    return %arg1, %c0_i32 : i32, i32
  }
  func.func @transform_3(%arg0: i32, %arg1: i32, %arg2: i32) -> (i32, i32) {
    %c0_i32 = arith.constant 0 : i32
    %c0_i32_0 = arith.constant 0 : i32
    return %arg1, %c0_i32 : i32, i32
  }
  func.func @transform_4(%arg0: i32, %arg1: i32, %arg2: i32) -> (i32, i32) {
    %c0_i32 = arith.constant 0 : i32
    %c0_i32_0 = arith.constant 0 : i32
    %c0_i32_1 = arith.constant 0 : i32
    return %c0_i32, %c0_i32_0 : i32, i32
  }
  func.func @transform_5(%arg0: i32, %arg1: i32, %arg2: i32) -> (i32, i32, i32) {
    %c0_i32 = arith.constant 0 : i32
    %c0_i32_0 = arith.constant 0 : i32
    return %arg0, %arg1, %c0_i32 : i32, i32, i32
  }
}

</mosaic_0001>

<bundles_post_ra>
// kernel: tpu_custom_call.1
= control target key start
LH: loop header
LB: loop body
LE: loop exit
PB: predicated region body
PF: predicated region fallthrough
CT: control target
= control target key end

     0   :  { %s1767_s0 = inlined_call_operand.hbm [shape: f32[2,16,256], index: 0, kind: input, shape index: {}]   ;;  %s1768_s1 = inlined_call_operand.hbm [shape: f32[256,128], index: 1, kind: input, shape index: {}]   ;;  %s1769_s2 = inlined_call_operand.vmem [shape: bf16[32,16], index: 2, kind: input, shape index: {}]   ;;  %s1770_s3 = inlined_call_operand.hbm [shape: f32[32,128], index: 3, kind: input, shape index: {}]   ;;  %s1771_s4 = inlined_call_operand.hbm [shape: bf16[128,256], index: 4, kind: input, shape index: {}]   ;;  %s1772_s5 = inlined_call_operand.hbm [shape: bf16[2,32,256], index: 5, kind: output, shape index: {}]  }
   0x1   :  { %1792 = sst [smem:[#allocation31_spill]] %s1768_s1 }
   0x2   :  { %1793 = sst [smem:[#allocation32_spill]] %s1769_s2 }
   0x3   :  { %1794 = sst [smem:[#allocation33_spill]] %s1772_s5 }
   0x4   :  { %10 = vsyncpa [#allocation4], 0 }
   0x5   :  { %12 = vsyncpa [#allocation4 + $0x1], 0 }
   0x6   :  { %13 = vsyncpa [#allocation7], 0 }
   0x7   :  { %14 = vsyncpa [#allocation5], 0 }
   0x8   :  { %16 = vsyncpa [#allocation5 + $0x1], 0  ;;  %s1410_s18 = smov 0   ;;  %s1412_s19 = smov 0  }
   0x9   :  { %s1414_s20 = smov 0   ;;  %s1416_s21 = smov 0  }
   0xa   :  { %s1418_s22 = smov 0   ;;  %s1420_s23 = smov 0  }
   0xb   :  { %s1422_s24 = smov 0   ;;  %s1424_s25 = smov 0  }
   0xc   :  { %s1426_s26 = smov 0   ;;  %s1428_s27 = smov 0  }
   0xd   :  { %s1430_s28 = smov 0   ;;  %s1432_s29 = smov 0  }
   0xe   :  { %s1434_s30 = smov 0   ;;  %s1436_s6 = smov 0  }
   0xf   :  { %s1438_s7 = smov 0   ;;  %s1440_s8 = smov 0  }
  0x10 LB: > { %1795 = sst [smem:[#allocation16_spill]] %s1312_s18  ;;  %s1491_s9 = sadd.s32 4294967295, %s1372_s8   ;;  %s1372_s8 = sphi %s1440_s8, %s22_s8   ;;  %s1368_s7 = sphi %s1438_s7, %s1857_s7   ;;  %s1364_s6 = sphi %s1436_s6, %s1856_s6   ;;  %s1360_s30 = sphi %s1434_s30, %s1845_s30   ;;  %s1356_s29 = sphi %s1432_s29, %s1855_s29   ;;  %s1352_s28 = sphi %s1430_s28, %s1854_s28   ;;  %s1348_s27 = sphi %s1428_s27, %s1844_s27   ;;  %s1344_s26 = sphi %s1426_s26, %s1853_s26   ;;  %s1340_s25 = sphi %s1424_s25, %s1852_s25   ;;  %s1336_s24 = sphi %s1422_s24, %s1851_s24   ;;  %s1332_s23 = sphi %s1420_s23, %s1850_s23   ;;  %s1328_s22 = sphi %s1418_s22, %s1849_s22   ;;  %s1324_s21 = sphi %s1416_s21, %s1848_s21   ;;  %s1320_s20 = sphi %s1414_s20, %s1841_s20   ;;  %s1316_s19 = sphi %s1412_s19, %s1840_s19   ;;  %s1312_s18 = sphi %s1410_s18, %s1839_s18  }
  0x11   : > { %1796 = sst [smem:[#allocation17_spill]] %s1316_s19  ;;  %p789_p0 = scmp.ge.s32.totalorder %s1372_s8, 1 }
  0x12   : > { %1797 = sst [smem:[#allocation18_spill]] %s1320_s20  ;;  %p68_p1 = scmp.eq.s32.totalorder %s1491_s9, 0 }
  0x13   : > { %1798 = sst [smem:[#allocation19_spill]] %s1348_s27  ;;  %p200_p3 = scmp.lt.s32.totalorder %s1372_s8, 9 }
  0x14   : > { %1799 = sst [smem:[#allocation20_spill]] %s1352_s28  ;;  %s1374_s14 = smov [#allocation6]  }
  0x15   : > { %1800 = sst [smem:[#allocation21_spill]] %s1356_s29  ;;  %p1500_p4 = pnand %p789_p0, %p200_p3 }
  0x16   : > { %1801 = sst [smem:[#allocation22_spill]] %s1360_s30  ;;  %s213_s15 = sshll.u32 %s1374_s14, 4  ;;  %s214_s15 = int_to_ptr.vmem [resolvable:$true] %s213_s15 }
  0x17   : > { %s1802_s1 = sld [smem:[#allocation31_spill]]  ;;  %p920_p5 = pneg %p1500_p4 }
  0x18   : > { %s1803_s13 = scalar_select %p1500_p4, 1, 0 }
  0x19   : > { %p1508_p6 = pnand %p920_p5, %p68_p1  ;;  %s1774_s17 = smov 128  }
  0x1a   : > { %s1776_s10 = smov 8   ;;  %s34_s14 = sadd.s32 1, %s1360_s30 }
  0x1b   : > { %p35_p7 = scmp.ge.s32.totalorder %s34_s14, 2  ;;  %s41_s5 = sadd.s32 1, %s1368_s7 }
  0x1c   : > { %p45_p8 = scmp.eq.s32.totalorder %s1364_s6, 0  ;;  %p61_p10 = scmp.ne.s32.totalorder %s1344_s26, %s1340_s25 }
  0x1d   : > { %s211_s12 = sshll.u32 %s1802_s1, 4  ;;  %s37_s1 = sadd.s32 1, %s1364_s6  ;;  %s212_s12 = int_to_ptr.hbm [resolvable:$true] %s211_s12 }
  0x1e   : > { %923 = dma.hbm_to_vmem [thread:$0]  (!%p1508_p6), %s212_s12, 4096, %s214_s15, [#allocation7], %s1774_s17, %s1774_s17, %s1776_s10  }
  0x1f   : > { %s1859_s14 = smov (%p35_p7, %s34_s14), 0  ;;  %s1861_s1 = smov (!%p35_p7, %s37_s1), %s1364_s6 }
  0x20   : > { %1805 = sst [smem:[#allocation23_spill]] %s1859_s14  ;;  %p39_p9 = scmp.ge.s32.totalorder %s1861_s1, 2 }
  0x21   : > { %s1526_s29 = scalar_select %p45_p8, %s1360_s30, 1 }
  0x22   : > { %s54_s12 = sadd.s32 1, %s1344_s26  ;;  %p62_p11 = scmp.eq.s32.totalorder %s1372_s8, 0 }
  0x23   : > { %s1863_s1 = smov (%p39_p9, %s1861_s1), 0  ;;  %s1865_s5 = smov (!%p39_p9, %s41_s5), %s1368_s7 }
  0x24   : > { %1806 = sst [smem:[#allocation24_spill]] %s1863_s1  ;;  %p47_p12 = scmp.eq.s32.totalorder %s1863_s1, 0 }
  0x25   : > { %p1538_p13 = por %p62_p11, %p61_p10  ;;  %p43_p0 = scmp.ge.s32.totalorder %s1865_s5, 2 }
  0x26   : > { %p67_p3 = scmp.ne.s32.totalorder %s1340_s25, %s1336_s24  ;;  %s124_s27 = ssub.s32 %s1364_s6, %s1863_s1 }
  0x27   : > { %s48_s17 = scalar_select %p47_p12, %s1859_s14, 1 }
  0x28   : > { %s1867_s5 = smov (%p43_p0, %s1865_s5), 0  ;;  %p1550_p5 = por %p68_p1, %p67_p3 }
  0x29   : > { %1808 = sst [smem:[#allocation25_spill]] %s1867_s5  ;;  %s50_s10 = ssub.s32 %s1526_s29, %s48_s17 }
  0x2a   : > { %s1809_s11 = scalar_select %p1550_p5, 1, 0 }
  0x2b   : > { %s49_s30 = ssub.s32 %s1368_s7, %s1867_s5  ;;  %p125_p7 = scmp.eq.s32.totalorder %s124_s27, 0 }
  0x2c   : > { %s51_s24 = sor.u32 %s50_s10, %s49_s30  ;;  %s127_s14 = sadd.s32 1, %s1332_s23 }
  0x2d   : > { %p52_p8 = scmp.eq.s32.totalorder %s51_s24, 0  ;;  %p134_p9 = scmp.ne.s32.totalorder %s1332_s23, %s1328_s22 }
  0x2e   : > { %s1560_s17 = scalar_select %p125_p7, %s1332_s23, %s127_s14  }
  0x2f   : > { %s1563_s2 = scalar_select %p52_p8, %s1344_s26, %s54_s12  }
  0x30   : > { %1810 = sst [smem:[#allocation26_spill]] %s1560_s17  ;;  %p140_p10 = scmp.ne.s32.totalorder %s1328_s22, %s1324_s21 }
  0x31   : > { %1811 = sst [smem:[#allocation27_spill]] %s1563_s2  ;;  %s173_s5 = sor.u32 %s124_s27, %s49_s30 }
  0x32   : > { %s176_s1 = sadd.s32 1, %s1320_s20  ;;  %p1572_p12 = por %p134_p9, %p62_p11 }
  0x33   : > { %p1578_p0 = por %p140_p10, %p68_p1  ;;  %p174_p3 = scmp.eq.s32.totalorder %s173_s5, 0 }
  0x34   : > { %p186_p7 = scmp.ne.s32.totalorder %s1320_s20, %s1316_s19  ;;  %p192_p8 = scmp.ne.s32.totalorder %s1316_s19, %s1312_s18 }
  0x35   : > { %s1814_s14 = sadd.s32 4294967294, %s1372_s8   ;;  %p1816_p5 = scmp.eq.s32.totalorder %s1491_s9, 7 }
  0x36   : > { %p193_p2 = scmp.eq.s32.totalorder %s1814_s14, 7  ;;  %p940_p9 = scmp.lt.s32.totalorder %s1372_s8, 8 }
  0x37   : > { %s1589_s21 = scalar_select %p174_p3, %s1320_s20, %s176_s1  }
  0x38   : > { %p1593_p4 = por %p1816_p5, %p186_p7  ;;  %p1597_p11 = por %p193_p2, %p192_p8 }
  0x39   : > { %1815 = sst [smem:[#allocation28_spill]] %s1589_s21  ;;  %s241_s5 = sand.u32 1, %s1372_s8  }
  0x3a   : > { %s1817_s27 = scalar_select %p1593_p4, 1, 0 }
  0x3b   : > { %s1819_s30 = scalar_select %p1597_p11, 1, 0 }
  0x3c   : > { %1818 = sst [smem:[#allocation29_spill]] %s1817_s27  ;;  %s243_s12 = sand.u32 1, %s1344_s26  }
  0x3d   : > { %1820 = sst [smem:[#allocation30_spill]] %s1819_s30  ;;  %s793_s2 = sshll.u32 %s243_s12, 4 }
  0x3e   : > { %s794_s14 = sshll.u32 %s1526_s29, 1  ;;  %s795_s17 = sshll.u32 %s1368_s7, 2 }
  0x3f   : > { %s252_s18 = sadd.s32 %s795_s17, %s794_s14  ;;  %s245_s1 = scalar_lea.vmem [#allocation3], %s793_s2 }
  0x40   : > { %s258_s21 = sshll.u32 %s245_s1, 4  ;;  %s796_s20 = sshll.u32 %s252_s18, 3  ;;  %s259_s21 = int_to_ptr.vmem [resolvable:$true] %s258_s21 }
  0x41   : > { %s254_s19 = scalar_lea.hbm %s1767_s0, %s796_s20  ;;  %p928_p2 = pnand %p940_p9, %p1538_p13 }
  0x42   : > { %s256_s30 = sshll.u32 %s254_s19, 4  ;;  %p1617_p5 = pnand %p940_p9, %p1572_p12  ;;  %s257_s30 = int_to_ptr.hbm [resolvable:$true] %s256_s30 }
  0x43   : > { %s242_s2 = scalar_lea.sflag [#allocation4], %s241_s5  ;;  %s225_s28 = sshll.u32 %s1771_s4, 4  ;;  %s226_s28 = int_to_ptr.hbm [resolvable:$true] %s225_s28 }
  0x44   : > { %930 = dma.hbm_to_vmem [thread:$0]  (!%p928_p2), %s257_s30, 256, %s259_s21, %s242_s2  }
  0x45   : > { %s1377_s20 = smov [#allocation9]   ;;  %s276_s27 = sand.u32 1, %s1332_s23  }
  0x46   : > { %s227_s15 = sshll.u32 %s1377_s20, 4  ;;  %s797_s19 = sshll.u32 %s276_s27, 4  ;;  %s228_s15 = int_to_ptr.vmem [resolvable:$true] %s227_s15 }
  0x47   : > { %s1822_s10 = smov 8   ;;  %s1823_s12 = smov 128  }
  0x48   : > { %926 = dma.hbm_to_vmem [thread:$0]  (!%p1508_p6), %s226_s28, 2048, %s228_s15, [#allocation7], %s1823_s12, %s1823_s12, %s1822_s10  }
  0x49   : > { %s887_s14 = sshll.u32 %s1364_s6, 4  ;;  %s278_s30 = scalar_lea.vmem [#allocation8], %s797_s19 }
  0x4a   : > { %s283_s21 = scalar_lea.hbm %s1770_s3, %s887_s14  ;;  %s286_s18 = sshll.u32 %s278_s30, 4  ;;  %s287_s18 = int_to_ptr.vmem [resolvable:$true] %s286_s18 }
  0x4b   : > { %s284_s17 = sshll.u32 %s283_s21, 4  ;;  %p1824_p13 = scmp.ne.s32.totalorder %s1803_s13, 0  ;;  %s285_s17 = int_to_ptr.hbm [resolvable:$true] %s284_s17 }
  0x4c   : > { %933 = dma.hbm_to_vmem [thread:$0]  (!%p1617_p5), %s285_s17, 256, %s287_s18, %s242_s2, %s1823_s12, %s1823_s12, %s1822_s10  }
  0x4d   : > { %298 = sbr.rel (%p1824_p13) target bundleno = 596 (0x254), region = 40  ;;  %s300_s16 = sand.u32 (!%p1824_p13), 1, %s1491_s9  }
  0x4e   : > { %s302_s28 = sand.u32 (!%p1824_p13), 1, %s1340_s25   ;;  %s301_s15 = scalar_lea.sflag (!%p1824_p13), [#allocation4], %s300_s16 }
  0x4f   : > { %s1643_s20 = sshll.u32 (!%p1824_p13), %s302_s28, 4  ;;  %p1825_p6 = scmp.ne.s32.totalorder (!%p1824_p13), %s1809_s11, 0 }
  0x50   : > { %s304_s27 = scalar_lea.vmem (!%p1824_p13), [#allocation3], %s1643_s20 }
  0x52   : > { %1291 = dma.done.wait (%p1825_p6), %s301_s15, 256  }
  0x53   : > { %1293 = vsyncadd (%p1825_p6), %s301_s15, 4294967040 }
  0x54   : > { %1295 = dma.done.wait (%p68_p1), [#allocation7], 4096  }
  0x55   : > { %1297 = vsyncadd (%p68_p1), [#allocation7], 4294963200  ;;  %s317_s13 = sand.u32 1, %s1328_s22  }
  0x56   : > { %s1655_s29 = sshll.u32 %s317_s13, 4 }
  0x57   : > { %s319_s2 = scalar_lea.vmem [#allocation8], %s1655_s29 }
  0x58   : > { %1299 = dma.done.wait (%p1578_p0), %s301_s15, 256  }
  0x59   : > { %1301 = vsyncadd (%p1578_p0), %s301_s15, 4294967040 }
  0x5a   : > { %1303 = dma.done.wait (%p68_p1), [#allocation7], 2048  }
  0x5b   : > { %1305 = vsyncadd (%p68_p1), [#allocation7], 4294965248  ;;  %s1826_s11 = sld [smem:[#allocation17_spill]] }
  0x5c   : > { %s1827_s19 = sld [smem:[#allocation20_spill]] }
  0x5d   : > { %s1828_s24 = sld [smem:[#allocation32_spill]] }
  0x61   : > { %s359_s10 = sand.u32 1, %s1826_s11  }
  0x62   : > { %s806_s12 = sshll.u32 %s1827_s19, 1  ;;  %s805_s14 = sshll.u32 %s359_s10, 4 }
  0x63   : > { %p365_p10 = scmp.lt.s32.totalorder %s806_s12, 3  ;;  %s1675_s18 = scalar_lea.vmem [#allocation10], %s805_s14 }
  0x64   : > { %p808_p12 = scmp.ne.s32.totalorder %s1827_s19, 0 }
  0x65   : > { %s1869_s12 = smov (!%p365_p10, %s806_s12), 3  ;;  %s1829_s9 = sld [smem:[#allocation19_spill]] (!%p808_p12) }
  0x66   : > { %s807_s1 = sshll.u32 %s1869_s12, 2  ;;  %376 = sbr.rel (%p808_p12) target bundleno = 269 (0x10d), region = 60 }
  0x67   : > { %s1673_s30 = scalar_lea.vmem %s1828_s24, %s807_s1 }
  0x6b   : > { %v395_v0 = vld [vmem:[#allocation6 + $0x78] sm:$0xff]  ;;  %v394_v2 = vld [vmem:[#allocation6 + $0x70] sm:$0xff]  ;;  %v393_v4 = vld [vmem:[#allocation6 + $0x68] sm:$0xff]  ;;  %s809_s17 = sshll.u32 %s1829_s9, 3 }
  0x6c   : > { %v411_v1 = vld [vmem:[#allocation6 + $0xf8] sm:$0xff]  ;;  %412 = vmatpush.msra.mxu0 %v395_v0  ;;  %v410_v3 = vld [vmem:[#allocation6 + $0xf0] sm:$0xff]  ;;  %v409_v5 = vld [vmem:[#allocation6 + $0xe8] sm:$0xff]  ;;  %s452_s16 = scalar_lea.vmem [#allocation2], %s809_s17 }
  0x6d   : > { %432 = vmatpush.msra.mxu1 %v411_v1  ;;  %v392_v6 = vld [vmem:[#allocation6 + $0x60] sm:$0xff]  ;;  %v391_v8 = vld [vmem:[#allocation6 + $0x58] sm:$0xff]  ;;  %v390_v10 = vld [vmem:[#allocation6 + $0x50] sm:$0xff] }
  0x6e   : > { %413 = vmatpush.msra.mxu0 %v394_v2  ;;  %v408_v7 = vld [vmem:[#allocation6 + $0xe0] sm:$0xff]  ;;  %v407_v9 = vld [vmem:[#allocation6 + $0xd8] sm:$0xff]  ;;  %v406_v11 = vld [vmem:[#allocation6 + $0xd0] sm:$0xff] }
  0x6f   : > { %433 = vmatpush.msra.mxu1 %v410_v3  ;;  %v389_v12 = vld [vmem:[#allocation6 + $0x48] sm:$0xff]  ;;  %v388_v14 = vld [vmem:[#allocation6 + $0x40] sm:$0xff]  ;;  %v387_v16 = vld [vmem:[#allocation6 + $0x38] sm:$0xff] }
  0x70   : > { %414 = vmatpush.msra.mxu0 %v393_v4  ;;  %v405_v13 = vld [vmem:[#allocation6 + $0xc8] sm:$0xff]  ;;  %v404_v15 = vld [vmem:[#allocation6 + $0xc0] sm:$0xff]  ;;  %v403_v17 = vld [vmem:[#allocation6 + $0xb8] sm:$0xff] }
  0x71   : > { %434 = vmatpush.msra.mxu1 %v409_v5  ;;  %v386_v18 = vld [vmem:[#allocation6 + $0x30] sm:$0xff]  ;;  %v385_v20 = vld [vmem:[#allocation6 + $0x28] sm:$0xff]  ;;  %v384_v22 = vld [vmem:[#allocation6 + $0x20] sm:$0xff] }
  0x72   : > { %415 = vmatpush.msra.mxu0 %v392_v6  ;;  %v402_v19 = vld [vmem:[#allocation6 + $0xb0] sm:$0xff]  ;;  %v401_v21 = vld [vmem:[#allocation6 + $0xa8] sm:$0xff]  ;;  %v400_v23 = vld [vmem:[#allocation6 + $0xa0] sm:$0xff] }
  0x73   : > { %435 = vmatpush.msra.mxu1 %v408_v7  ;;  %v383_v24 = vld [vmem:[#allocation6 + $0x18] sm:$0xff]  ;;  %v382_v26 = vld [vmem:[#allocation6 + $0x10] sm:$0xff]  ;;  %v381_v28 = vld [vmem:[#allocation6 + $0x8] sm:$0xff] }
  0x74   : > { %416 = vmatpush.msra.mxu0 %v391_v8  ;;  %v399_v25 = vld [vmem:[#allocation6 + $0x98] sm:$0xff]  ;;  %v398_v27 = vld [vmem:[#allocation6 + $0x90] sm:$0xff]  ;;  %v397_v29 = vld [vmem:[#allocation6 + $0x88] sm:$0xff] }
  0x75   : > { %436 = vmatpush.msra.mxu1 %v407_v9  ;;  %v380_v30 = vld [vmem:[#allocation6] sm:$0xff]  ;;  %v379_v33 = vld [vmem:[%s304_s27 + $0x8] sm:$0xff] }
  0x76   : > { %417 = vmatpush.msra.mxu0 %v390_v10  ;;  %v396_v31 = vld [vmem:[#allocation6 + $0x80] sm:$0xff] }
  0x77   : > { %437 = vmatpush.msra.mxu1 %v406_v11  ;;  %v378_v32 = vld [vmem:[%s304_s27] sm:$0xff] }
  0x78   : > { %418 = vmatpush.msra.mxu0 %v389_v12 }
  0x79   : > { %438 = vmatpush.msra.mxu1 %v405_v13 }
  0x7a   : > { %419 = vmatpush.msra.mxu0 %v388_v14 }
  0x7b   : > { %439 = vmatpush.msra.mxu1 %v404_v15 }
  0x7c   : > { %420 = vmatpush.msra.mxu0 %v387_v16 }
  0x7d   : > { %440 = vmatpush.msra.mxu1 %v403_v17 }
  0x7e   : > { %421 = vmatpush.msra.mxu0 %v386_v18 }
  0x7f   : > { %441 = vmatpush.msra.mxu1 %v402_v19 }
  0x80   : > { %422 = vmatpush.msra.mxu0 %v385_v20 }
  0x81   : > { %442 = vmatpush.msra.mxu1 %v401_v21 }
  0x82   : > { %423 = vmatpush.msra.mxu0 %v384_v22 }
  0x83   : > { %443 = vmatpush.msra.mxu1 %v400_v23 }
  0x84   : > { %424 = vmatpush.msra.mxu0 %v383_v24 }
  0x85   : > { %444 = vmatpush.msra.mxu1 %v399_v25 }
  0x86   : > { %425 = vmatpush.msra.mxu0 %v382_v26 }
  0x87   : > { %445 = vmatpush.msra.mxu1 %v398_v27 }
  0x88   : > { %426 = vmatpush.msra.mxu0 %v381_v28 }
  0x89   : > { %446 = vmatpush.msra.mxu1 %v397_v29 }
  0x8a   : > { %427 = vmatpush.msra.mxu0 %v380_v30 }
  0x8b   : > { %447 = vmatpush.msra.mxu1 %v396_v31  ;;  %428 = vmatmul.f32.vlgmr.msra.gmra.mxu0 %v378_v32 }
  0x8c   : > { %448 = vmatmul.f32.vlgmr.msra.gmra.mxu1 %v379_v33 }
 0x108   : > { %v429_v34 = vpop.f32.mrf.mxu0 }
 0x109   : > { %v449_v35 = vpop.f32.mrf.mxu1 }
 0x10a   : > { %v450_v36 = vadd.f32 %v449_v35, %v429_v34 }
 0x10c   : > { %453 = vst [vmem:[%s452_s16] sm:$0xff] %v450_v36 }
 0x10d PF: > { %s1830_s28 = sld [smem:[#allocation19_spill]] }
 0x113   : > { %p810_p1 = scmp.ne.s32.totalorder %s1830_s28, 1 }
 0x115   : > { %457 = sbr.rel (%p810_p1) target bundleno = 571 (0x23b), region = 64 }
 0x11a   : > { %v460_v37 = vld [vmem:[#allocation2] sm:$0xff]  ;;  %v461_v38 = vld [vmem:[#allocation2 + $0x8] sm:$0xff]  ;;  %v866_v46 = vld [vmem:[#allocation9 + $0x60] sm:$0xf]  ;;  %vm470_vm0 = vcmask 130048  }
 0x11b   : > { %v888_v39 = vld [vmem:[%s1673_s30] sm:$0xff]  ;;  %v462_v40 = vpack.c.bf16 %v461_v38, %v460_v37  ;;  %v904_v42 = vld [vmem:[#allocation9 + $0x74] sm:$0xf0]  ;;  %v876_v45 = vld [vmem:[#allocation9 + $0x78] sm:$0xf0] }
 0x11c   : > { %v874_v41 = vld [vmem:[#allocation9 + $0x70] sm:$0xf]  ;;  %v903_v43 = vld [vmem:[#allocation9 + $0x74] sm:$0xf]  ;;  %v902_v47 = vld [vmem:[#allocation9 + $0x64] sm:$0xf0] }
 0x11d   : > { %v875_v44 = vor.u32 %v904_v42, %v874_v41  ;;  %481 = vmatpush.bf16.msra.mxu0 %v462_v40  ;;  %v879_v48 = vor.u32 %v903_v43, %v876_v45  ;;  %v901_v49 = vld [vmem:[#allocation9 + $0x64] sm:$0xf]  ;;  %v868_v50 = vld [vmem:[#allocation9 + $0x68] sm:$0xf0]  ;;  %v867_v51 = vor.u32 %v902_v47, %v866_v46  ;;  %v858_v53 = vld [vmem:[#allocation9 + $0x50] sm:$0xf] }
 0x11e   : > { %v871_v52 = vor.u32 %v901_v49, %v868_v50  ;;  %v900_v54 = vld [vmem:[#allocation9 + $0x54] sm:$0xf0]  ;;  %v899_v55 = vld [vmem:[#allocation9 + $0x54] sm:$0xf]  ;;  %v860_v56 = vld [vmem:[#allocation9 + $0x58] sm:$0xf0] }
 0x11f   : > { %587 = vmatpush.bf16.msra.mxu1 %v875_v44  ;;  %601 = vmatpush.bf16.msra.mxu2 %v879_v48  ;;  %v859_v57 = vor.u32 %v900_v54, %v858_v53  ;;  %v863_v58 = vor.u32 %v899_v55, %v860_v56  ;;  %v850_v59 = vld [vmem:[#allocation9 + $0x40] sm:$0xf]  ;;  %v898_v60 = vld [vmem:[#allocation9 + $0x44] sm:$0xf0]  ;;  %v897_v61 = vld [vmem:[#allocation9 + $0x44] sm:$0xf] }
 0x120   : > { %815 = vmatmul.msk.bf16.vlgmr.msra.gmra.mxu0 %vm470_vm0, %v888_v39  ;;  %v852_v62 = vld [vmem:[#allocation9 + $0x48] sm:$0xf0]  ;;  %v851_v63 = vor.u32 %v898_v60, %v850_v59  ;;  %v842_v1 = vld [vmem:[#allocation9 + $0x30] sm:$0xf]  ;;  %v896_v2 = vld [vmem:[#allocation9 + $0x34] sm:$0xf0] }
 0x121   : > { %v855_v0 = vor.u32 %v897_v61, %v852_v62  ;;  %v895_v3 = vld [vmem:[#allocation9 + $0x34] sm:$0xf]  ;;  %v843_v4 = vor.u32 %v896_v2, %v842_v1  ;;  %v844_v5 = vld [vmem:[#allocation9 + $0x38] sm:$0xf0]  ;;  %v834_v7 = vld [vmem:[#allocation9 + $0x20] sm:$0xf] }
 0x122   : > { %v847_v6 = vor.u32 %v895_v3, %v844_v5  ;;  %v894_v8 = vld [vmem:[#allocation9 + $0x24] sm:$0xf0]  ;;  %v893_v9 = vld [vmem:[#allocation9 + $0x24] sm:$0xf]  ;;  %v836_v11 = vld [vmem:[#allocation9 + $0x28] sm:$0xf0] }
 0x123   : > { %588 = vmatpush.bf16.msra.mxu1 %v867_v51  ;;  %602 = vmatpush.bf16.msra.mxu2 %v871_v52  ;;  %v835_v10 = vor.u32 %v894_v8, %v834_v7  ;;  %v839_v12 = vor.u32 %v893_v9, %v836_v11  ;;  %v826_v13 = vld [vmem:[#allocation9 + $0x10] sm:$0xf]  ;;  %v892_v14 = vld [vmem:[#allocation9 + $0x14] sm:$0xf0]  ;;  %v891_v15 = vld [vmem:[#allocation9 + $0x14] sm:$0xf] }
 0x124   : > { %v827_v16 = vor.u32 %v892_v14, %v826_v13  ;;  %v828_v17 = vld [vmem:[#allocation9 + $0x18] sm:$0xf0]  ;;  %v818_v19 = vld [vmem:[#allocation9] sm:$0xf]  ;;  %v890_v20 = vld [vmem:[#allocation9 + $0x4] sm:$0xf0] }
 0x125   : > { %v831_v18 = vor.u32 %v891_v15, %v828_v17  ;;  %v889_v21 = vld [vmem:[#allocation9 + $0x4] sm:$0xf]  ;;  %v819_v22 = vor.u32 %v890_v20, %v818_v19  ;;  %v820_v23 = vld [vmem:[#allocation9 + $0x8] sm:$0xf0] }
 0x126   : > { %v823_v24 = vor.u32 %v889_v21, %v820_v23  ;;  %v463_v26 = vld [vmem:[%s319_s2] sm:$0xff]  ;;  %v464_v27 = vld [vmem:[%s319_s2 + $0x8] sm:$0xff] }
 0x127   : > { %589 = vmatpush.bf16.msra.mxu1 %v859_v57  ;;  %603 = vmatpush.bf16.msra.mxu2 %v863_v58 }
 0x12b   : > { %590 = vmatpush.bf16.msra.mxu1 %v851_v63  ;;  %604 = vmatpush.bf16.msra.mxu2 %v855_v0 }
 0x12f   : > { %591 = vmatpush.bf16.msra.mxu1 %v843_v4  ;;  %605 = vmatpush.bf16.msra.mxu2 %v847_v6 }
 0x133   : > { %592 = vmatpush.bf16.msra.mxu1 %v835_v10  ;;  %606 = vmatpush.bf16.msra.mxu2 %v839_v12 }
 0x137   : > { %593 = vmatpush.bf16.msra.mxu1 %v827_v16  ;;  %607 = vmatpush.bf16.msra.mxu2 %v831_v18 }
 0x13b   : > { %594 = vmatpush.bf16.msra.mxu1 %v819_v22  ;;  %608 = vmatpush.bf16.msra.mxu2 %v823_v24 }
 0x19d   : > { %v483_v25 = vpop.f32.mrf.mxu0 }
 0x19e   : > { %v484_v28 = vadd.f32 %v483_v25, %v463_v26 }
 0x1a0   : > { %v488_v31 = vmax.f32 %v484_v28, 0.0 }
 0x1a5   : > { %v485_v29 = vpop.f32.mrf.mxu0 }
 0x1a6   : > { %v486_v30 = vadd.f32 %v485_v29, %v464_v27 }
 0x1a8   : > { %v489_v32 = vmax.f32 %v486_v30, 0.0 }
 0x1aa   : > { %v490_v33 = vpack.c.bf16 %v489_v32, %v488_v31 }
 0x1ac   : > { %595 = vmatmul.bf16.vlgmr.msra.gmra.mxu1 %v490_v33  ;;  %609 = vmatmul.bf16.vlgmr.msra.gmra.mxu2 %v490_v33 }
 0x229   : > { %v596_v34 = vpop.f32.mrf.mxu1 }
 0x22f   : > { %v610_v35 = vpop.f32.mrf.mxu2 }
 0x230   : > { %v615_v36 = vpack.c.bf16 %v610_v35, %v596_v34 }
 0x231   : > { %v598_v37 = vpop.f32.mrf.mxu1 }
 0x232   : > { %617 = vst [vmem:[%s1675_s18] sm:$0xff] %v615_v36 }
 0x237   : > { %v612_v38 = vpop.f32.mrf.mxu2 }
 0x238   : > { %v616_v39 = vpack.c.bf16 %v612_v38, %v598_v37 }
 0x23a   : > { %618 = vst [vmem:[%s1675_s18 + $0x8] sm:$0xff] %v616_v39 }
 0x23b PF: > { %s1831_s20 = sld [smem:[#allocation20_spill]]  ;;  %s635_s11 = sshll.u32 %s1675_s18, 4  ;;  %s636_s11 = int_to_ptr.vmem [resolvable:$true] %s635_s11 }
 0x23c   : > { %s1832_s15 = sld [smem:[#allocation21_spill]]  ;;  %s620_s30 = scalar_lea.sflag [#allocation5], %s359_s10 }
 0x23d   : > { %s1835_s5 = sld [smem:[#allocation33_spill]] }
 0x241   : > { %s905_s29 = sshll.u32 %s1831_s20, 2 }
 0x242   : > { %s883_s2 = sshll.u32 %s1832_s15, 3 }
 0x243   : > { %s632_s19 = sadd.s32 %s905_s29, %s883_s2  ;;  %s1218_s28 = scalar_lea.hbm %s1835_s5, 64 }
 0x244   : > { %s884_s12 = sshll.u32 %s632_s19, 2 }
 0x245   : > { %s634_s21 = scalar_lea.hbm %s1835_s5, %s884_s12 }
 0x246   : > { %s637_s24 = sshll.u32 %s634_s21, 4  ;;  %s638_s24 = int_to_ptr.hbm [resolvable:$true] %s637_s24 }
 0x247   : > { %s1212_s9 = sshra.s32 %s638_s24, 4  ;;  %s1213_s9 = int_to_ptr.hbm [resolvable:$true] %s1212_s9 }
 0x248   : > { %s1214_s17 = scalar_lea.hbm %s1213_s9, 16  ;;  %p1219_p8 = scmp.lt.s32.totalorder %s1213_s9, %s1835_s5 }
 0x249   : > { %p1215_p0 = scmp.ne.s32.totalorder %s1213_s9, %s1214_s17  ;;  %p1220_p9 = scmp.lt.s32.totalorder %s1218_s28, %s1214_s17 }
 0x24b   : > { %p1216_p3 = pnand %p1215_p0, %p1593_p4  ;;  %p1221_p2 = por %p1220_p9, %p1219_p8 }
 0x24d   : > { %p1217_p7 = pneg %p1216_p3 }
 0x24f   : > { %p1222_p5 = pnand %p1221_p2, %p1217_p7 }
 0x251   : > { %1225 = shalt.err (!%p1222_p5)
}
 0x252   : > { %s1378_s10 = smov 128   ;;  %s1379_s27 = smov 8  }
 0x253   : > { %918 = dma.vmem_to_hbm [thread:$0]  (%p1593_p4), %s636_s11, 256, %s638_s24, %s620_s30, %s1378_s10, %s1378_s10, %s1379_s27  }
 0x254 PF: > { %s1836_s29 = sld [smem:[#allocation16_spill]]  ;;  %p943_p13 = scmp.ge.s32.totalorder %s1372_s8, 2 }
 0x256   : > { %p935_p6 = pnand %p943_p13, %p1597_p11 }
 0x258   : > { %p936_p10 = pneg %p935_p6 }
 0x25a   : > { %s652_s19 = sand.u32 1, %s1836_s29  }
 0x25b   : > { %s653_s12 = scalar_lea.sflag [#allocation5], %s652_s19 }
 0x25c   : > { %1307 = dma.done.wait (%p936_p10), %s653_s12, 256  }
 0x25d   : > { %1309 = vsyncadd (%p936_p10), %s653_s12, 4294967040  ;;  %s22_s8 = sadd.s32 1, %s1372_s8   ;;  %s1839_s18 = sld [smem:[#allocation17_spill]] }
 0x25e   : > { %p1714_p12 = scmp.ge.s32.totalorder %s22_s8, 10   ;;  %s1840_s19 = sld [smem:[#allocation18_spill]] }
 0x25f   : > { %s1841_s20 = sld [smem:[#allocation28_spill]]  ;;  %s1848_s21 = smov %s1328_s22 }
 0x260   : > { %s1842_s13 = sld [smem:[#allocation26_spill]]  ;;  %s1849_s22 = smov %s1332_s23 }
 0x261   : > { %s1843_s11 = sld [smem:[#allocation27_spill]]  ;;  %s1851_s24 = smov %s1340_s25 }
 0x262   : > { %s1844_s27 = sld [smem:[#allocation22_spill]]  ;;  %s1852_s25 = smov %s1344_s26 }
 0x263   : > { %s1845_s30 = sld [smem:[#allocation23_spill]]  ;;  %s1854_s28 = smov %s1364_s6 }
 0x264   : > { %s1846_s1 = sld [smem:[#allocation24_spill]]  ;;  %s1855_s29 = smov %s1368_s7 }
 0x265   : > { %s1847_s9 = sld [smem:[#allocation25_spill]] }
 0x266   : > { %s1850_s23 = smov %s1842_s13 }
 0x267   : > { %s1853_s26 = smov %s1843_s11  ;;  %21 = sbr.rel (!%p1714_p12) target bundleno = 16 (0x10), region = 116 }
 0x26a   : > { %s1856_s6 = smov %s1846_s1 }
 0x26b   : > { %s1857_s7 = smov %s1847_s9 }
 0x26c   :  { %659 = vsyncpa [#allocation4], 1 }
 0x26d   :  { %661 = vsyncpa [#allocation4 + $0x1], 1 }
 0x26e   :  { %662 = vsyncpa [#allocation7], 1 }
 0x26f   :  { %663 = vsyncpa [#allocation5], 1 }
 0x270   :  { %665 = vsyncpa [#allocation5 + $0x1], 1 }

</bundles_post_ra>
